<compile_context>
chip_gen: v7x
topology: tpu7x:2x2x1
jax: 0.10.0
libtpu: 0.0.40
codegen_flags: <defaults>
</compile_context>

<pallas_src>
import jax
import jax.numpy as jnp
from jax.experimental import pallas as pl
from jax.experimental.pallas import tpu as pltpu

LANE = 128
SUBLANE = 8
TILE_B_MAX = 256  # budgeted for v7x 64 MiB VMEM; fine on v5e/v6e too


def _round_up(n, m):
    return (n + m - 1) // m * m


def _policy_mlp_kernel(x_ref, w1_ref, b1_ref, w2_ref, b2_ref, w3_ref, b3_ref, o_ref):
    # One (TILE_B, D_pad) activation slab per grid step; weights stay resident in VMEM.
    x = x_ref[...]  # bf16

    # fc1 + ReLU  (bf16 MXU, f32 accumulate; bias/ReLU in f32 on the VPU)
    h1 = jnp.dot(x, w1_ref[...], preferred_element_type=jnp.float32) + b1_ref[...]
    h1 = jnp.maximum(h1, 0.0)

    # fc2 + ReLU
    h2 = jnp.dot(h1.astype(jnp.bfloat16), w2_ref[...],
                 preferred_element_type=jnp.float32) + b2_ref[...]
    h2 = jnp.maximum(h2, 0.0)

    # fc3 (logits, no activation); output block is lane-dense (padded last dim = 128k)
    o_ref[...] = jnp.dot(h2.astype(jnp.bfloat16), w3_ref[...],
                         preferred_element_type=jnp.float32) + b3_ref[...]


def policy_network_forward(x, params):
    """x: (B, input_dims) f32. params: padded bf16 weights / f32 biases from init_params."""
    w1, b1 = params["w1"], params["b1"]
    w2, b2 = params["w2"], params["b2"]
    w3, b3 = params["w3"], params["b3"]
    num_actions = params["num_actions"]

    B, D = x.shape
    d_pad = w1.shape[0]   # padded input dims
    h_pad = w2.shape[0]   # padded hidden dims
    a_pad = w3.shape[1]   # padded num_actions

    # Batch tile: multiple of 8 (sublane), capped at TILE_B_MAX; pad batch to a multiple.
    tile_b = min(TILE_B_MAX, _round_up(B, SUBLANE))
    b_pad = _round_up(B, tile_b)

    # Pad batch + input features with zeros, cast activations to bf16 for the MXU.
    x_p = jnp.zeros((b_pad, d_pad), jnp.bfloat16).at[:B, :D].set(x.astype(jnp.bfloat16))

    grid = (b_pad // tile_b,)
    resident = lambda i: (0, 0)  # weights/biases: same block every step -> stay in VMEM

    out = pl.pallas_call(
        _policy_mlp_kernel,
        out_shape=jax.ShapeDtypeStruct((b_pad, a_pad), jnp.float32),
        grid=grid,
        in_specs=[
            pl.BlockSpec((tile_b, d_pad), lambda i: (i, 0)),  # x: tiled over batch
            pl.BlockSpec((d_pad, h_pad), resident),           # w1
            pl.BlockSpec((1, h_pad), resident),                # b1
            pl.BlockSpec((h_pad, h_pad), resident),            # w2
            pl.BlockSpec((1, h_pad), resident),                # b2
            pl.BlockSpec((h_pad, a_pad), resident),            # w3
            pl.BlockSpec((1, a_pad), resident),                # b3
        ],
        out_specs=pl.BlockSpec((tile_b, a_pad), lambda i: (i, 0)),
        compiler_params=pltpu.CompilerParams(
            dimension_semantics=("parallel",),  # shard batch across TCs on v7x
        ),
    )(x_p, w1, b1, w2, b2, w3, b3)

    # Strip batch / action padding before handing back to callers.
    return out[:B, :num_actions]


def init_params(key, input_dims, fc1_dims, fc2_dims, num_actions):
    """nn.Linear-style init (uniform +/- 1/sqrt(fan_in)), pre-transposed to (in, out),
    zero-padded to multiples of 128 and cast to bf16 (biases stay f32)."""
    assert fc1_dims == fc2_dims, "PyTorch module only works when fc1_dims == fc2_dims"

    d_pad = _round_up(input_dims, LANE)
    h_pad = _round_up(fc2_dims, LANE)
    a_pad = _round_up(num_actions, LANE)

    ks = jax.random.split(key, 6)

    def linear(kw, kb, fan_in, fan_out, in_pad, out_pad):
        bound = 1.0 / jnp.sqrt(jnp.float32(fan_in))
        w = jax.random.uniform(kw, (fan_in, fan_out), jnp.float32, -bound, bound)
        b = jax.random.uniform(kb, (1, fan_out), jnp.float32, -bound, bound)
        w_p = jnp.zeros((in_pad, out_pad), jnp.float32).at[:fan_in, :fan_out].set(w)
        b_p = jnp.zeros((1, out_pad), jnp.float32).at[:, :fan_out].set(b)
        return w_p.astype(jnp.bfloat16), b_p

    w1, b1 = linear(ks[0], ks[1], input_dims, fc2_dims, d_pad, h_pad)   # fc1
    w2, b2 = linear(ks[2], ks[3], fc1_dims, fc2_dims, h_pad, h_pad)     # fc2
    w3, b3 = linear(ks[4], ks[5], fc2_dims, num_actions, h_pad, a_pad)  # fc3
    return {"w1": w1, "b1": b1, "w2": w2, "b2": b2, "w3": w3, "b3": b3,
            "num_actions": num_actions}


def _reference_forward(x, params):
    """Pure-JAX reference mirroring the kernel math (bf16 inputs, f32 accumulation)."""
    B, D = x.shape
    d_pad = params["w1"].shape[0]
    x_p = jnp.zeros((B, d_pad), jnp.bfloat16).at[:, :D].set(x.astype(jnp.bfloat16))
    h1 = jnp.maximum(
        jnp.dot(x_p, params["w1"], preferred_element_type=jnp.float32) + params["b1"], 0.0)
    h2 = jnp.maximum(
        jnp.dot(h1.astype(jnp.bfloat16), params["w2"],
                preferred_element_type=jnp.float32) + params["b2"], 0.0)
    out = jnp.dot(h2.astype(jnp.bfloat16), params["w3"],
                  preferred_element_type=jnp.float32) + params["b3"]
    return out[:, :params["num_actions"]]


if __name__ == "__main__":
    key = jax.random.PRNGKey(0)
    k_params, k_x, k_x2 = jax.random.split(key, 3)

    batch = 8
    input_dims = 32
    fc1_dims = fc2_dims = 64
    num_actions = 8

    params = init_params(k_params, input_dims, fc1_dims, fc2_dims, num_actions)

    # Small case (single grid step).
    x = jax.random.normal(k_x, (batch, input_dims), jnp.float32)
    out = policy_network_forward(x, params)
    jax.block_until_ready(out)
    ref = _reference_forward(x, params)
    assert out.shape == (batch, num_actions)
    assert jnp.allclose(out, ref, atol=1e-3, rtol=1e-3), "mismatch vs reference (small)"

    # Larger, non-multiple batch to exercise the batch grid + padding path.
    x2 = jax.random.normal(k_x2, (300, input_dims), jnp.float32)
    out2 = policy_network_forward(x2, params)
    jax.block_until_ready(out2)
    ref2 = _reference_forward(x2, params)
    assert out2.shape == (300, num_actions)
    assert jnp.allclose(out2, ref2, atol=1e-3, rtol=1e-3), "mismatch vs reference (grid)"

    print("KERNEL_OK")
</pallas_src>

<mosaic_0001>
module attributes {stable_mosaic.version = 11 : i64} {
  func.func @_policy_mlp_kernel(%arg0: i32, %arg1: memref<8x128xbf16, #tpu.memory_space<vmem>>, %arg2: memref<128x128xbf16, #tpu.memory_space<vmem>>, %arg3: memref<1x128xf32, #tpu.memory_space<vmem>>, %arg4: memref<128x128xbf16, #tpu.memory_space<vmem>>, %arg5: memref<1x128xf32, #tpu.memory_space<vmem>>, %arg6: memref<128x128xbf16, #tpu.memory_space<vmem>>, %arg7: memref<1x128xf32, #tpu.memory_space<vmem>>, %arg8: memref<8x128xf32, #tpu.memory_space<vmem>>) attributes {dimension_semantics = [#tpu.dimension_semantics<parallel>], iteration_bounds = array<i64: 1>, scalar_prefetch = 0 : i64, scratch_operands = 0 : i64, tpu.core_type = #tpu.core_type<tc>, window_params = [{transform_indices = @transform_0, window_bounds = array<i64: 8, 128>}, {pipeline_mode = #tpu.pipeline_mode<synchronous>, transform_indices = @transform_1, window_bounds = array<i64: 128, 128>}, {pipeline_mode = #tpu.pipeline_mode<synchronous>, transform_indices = @transform_2, window_bounds = array<i64: 1, 128>}, {pipeline_mode = #tpu.pipeline_mode<synchronous>, transform_indices = @transform_3, window_bounds = array<i64: 128, 128>}, {pipeline_mode = #tpu.pipeline_mode<synchronous>, transform_indices = @transform_4, window_bounds = array<i64: 1, 128>}, {pipeline_mode = #tpu.pipeline_mode<synchronous>, transform_indices = @transform_5, window_bounds = array<i64: 128, 128>}, {pipeline_mode = #tpu.pipeline_mode<synchronous>, transform_indices = @transform_6, window_bounds = array<i64: 1, 128>}, {transform_indices = @transform_7, window_bounds = array<i64: 8, 128>}]} {
    %c0 = arith.constant 0 : index
    %c0_0 = arith.constant 0 : index
    %0 = vector.load %arg1[%c0, %c0_0] : memref<8x128xbf16, #tpu.memory_space<vmem>>, vector<8x128xbf16>
    %c0_1 = arith.constant 0 : index
    %c0_2 = arith.constant 0 : index
    %1 = vector.load %arg2[%c0_1, %c0_2] : memref<128x128xbf16, #tpu.memory_space<vmem>>, vector<128x128xbf16>
    %cst = arith.constant dense<0.000000e+00> : vector<8x128xf32>
    %2 = tpu.matmul %0, %1, %cst {dimension_numbers = #tpu.dot_dimension_numbers<[1], [0], [0], [1], [0, 0, 1, 1], [], []>} : vector<8x128xbf16>, vector<128x128xbf16>, vector<8x128xf32> -> vector<8x128xf32>
    %c0_3 = arith.constant 0 : index
    %c0_4 = arith.constant 0 : index
    %3 = vector.load %arg3[%c0_3, %c0_4] : memref<1x128xf32, #tpu.memory_space<vmem>>, vector<1x128xf32>
    %4 = vector.broadcast %3 : vector<1x128xf32> to vector<8x128xf32>
    %5 = arith.addf %2, %4 : vector<8x128xf32>
    %cst_5 = arith.constant 0.000000e+00 : f32
    %6 = vector.broadcast %cst_5 : f32 to vector<8x128xf32>
    %7 = arith.maximumf %5, %6 : vector<8x128xf32>
    %8 = arith.truncf %7 : vector<8x128xf32> to vector<8x128xbf16>
    %c0_6 = arith.constant 0 : index
    %c0_7 = arith.constant 0 : index
    %9 = vector.load %arg4[%c0_6, %c0_7] : memref<128x128xbf16, #tpu.memory_space<vmem>>, vector<128x128xbf16>
    %cst_8 = arith.constant dense<0.000000e+00> : vector<8x128xf32>
    %10 = tpu.matmul %8, %9, %cst_8 {dimension_numbers = #tpu.dot_dimension_numbers<[1], [0], [0], [1], [0, 0, 1, 1], [], []>} : vector<8x128xbf16>, vector<128x128xbf16>, vector<8x128xf32> -> vector<8x128xf32>
    %c0_9 = arith.constant 0 : index
    %c0_10 = arith.constant 0 : index
    %11 = vector.load %arg5[%c0_9, %c0_10] : memref<1x128xf32, #tpu.memory_space<vmem>>, vector<1x128xf32>
    %12 = vector.broadcast %11 : vector<1x128xf32> to vector<8x128xf32>
    %13 = arith.addf %10, %12 : vector<8x128xf32>
    %cst_11 = arith.constant 0.000000e+00 : f32
    %14 = vector.broadcast %cst_11 : f32 to vector<8x128xf32>
    %15 = arith.maximumf %13, %14 : vector<8x128xf32>
    %16 = arith.truncf %15 : vector<8x128xf32> to vector<8x128xbf16>
    %c0_12 = arith.constant 0 : index
    %c0_13 = arith.constant 0 : index
    %17 = vector.load %arg6[%c0_12, %c0_13] : memref<128x128xbf16, #tpu.memory_space<vmem>>, vector<128x128xbf16>
    %cst_14 = arith.constant dense<0.000000e+00> : vector<8x128xf32>
    %18 = tpu.matmul %16, %17, %cst_14 {dimension_numbers = #tpu.dot_dimension_numbers<[1], [0], [0], [1], [0, 0, 1, 1], [], []>} : vector<8x128xbf16>, vector<128x128xbf16>, vector<8x128xf32> -> vector<8x128xf32>
    %c0_15 = arith.constant 0 : index
    %c0_16 = arith.constant 0 : index
    %19 = vector.load %arg7[%c0_15, %c0_16] : memref<1x128xf32, #tpu.memory_space<vmem>>, vector<1x128xf32>
    %20 = vector.broadcast %19 : vector<1x128xf32> to vector<8x128xf32>
    %21 = arith.addf %18, %20 : vector<8x128xf32>
    %c0_17 = arith.constant 0 : index
    %c0_18 = arith.constant 0 : index
    %22 = vector.load %arg8[%c0_17, %c0_18] : memref<8x128xf32, #tpu.memory_space<vmem>>, vector<8x128xf32>
    tpu.vector_store %arg8[%c0_17, %c0_18], %21 {strides = array<i32>} : memref<8x128xf32, #tpu.memory_space<vmem>>, vector<8x128xf32>,
    return
  }
  func.func @transform_0(%arg0: i32) -> (i32, i32) {
    %c0_i32 = arith.constant 0 : i32
    %c0_i32_0 = arith.constant 0 : i32
    return %arg0, %c0_i32 : i32, i32
  }
  func.func @transform_1(%arg0: i32) -> (i32, i32) {
    %c0_i32 = arith.constant 0 : i32
    %c0_i32_0 = arith.constant 0 : i32
    %c0_i32_1 = arith.constant 0 : i32
    return %c0_i32, %c0_i32_0 : i32, i32
  }
  func.func @transform_2(%arg0: i32) -> (i32, i32) {
    %c0_i32 = arith.constant 0 : i32
    %c0_i32_0 = arith.constant 0 : i32
    %c0_i32_1 = arith.constant 0 : i32
    return %c0_i32, %c0_i32_0 : i32, i32
  }
  func.func @transform_3(%arg0: i32) -> (i32, i32) {
    %c0_i32 = arith.constant 0 : i32
    %c0_i32_0 = arith.constant 0 : i32
    %c0_i32_1 = arith.constant 0 : i32
    return %c0_i32, %c0_i32_0 : i32, i32
  }
  func.func @transform_4(%arg0: i32) -> (i32, i32) {
    %c0_i32 = arith.constant 0 : i32
    %c0_i32_0 = arith.constant 0 : i32
    %c0_i32_1 = arith.constant 0 : i32
    return %c0_i32, %c0_i32_0 : i32, i32
  }
  func.func @transform_5(%arg0: i32) -> (i32, i32) {
    %c0_i32 = arith.constant 0 : i32
    %c0_i32_0 = arith.constant 0 : i32
    %c0_i32_1 = arith.constant 0 : i32
    return %c0_i32, %c0_i32_0 : i32, i32
  }
  func.func @transform_6(%arg0: i32) -> (i32, i32) {
    %c0_i32 = arith.constant 0 : i32
    %c0_i32_0 = arith.constant 0 : i32
    %c0_i32_1 = arith.constant 0 : i32
    return %c0_i32, %c0_i32_0 : i32, i32
  }
  func.func @transform_7(%arg0: i32) -> (i32, i32) {
    %c0_i32 = arith.constant 0 : i32
    %c0_i32_0 = arith.constant 0 : i32
    return %arg0, %c0_i32 : i32, i32
  }
}

</mosaic_0001>

<bundles_post_ra>
// kernel: tpu_custom_call.1
= control target key start
LH: loop header
LB: loop body
LE: loop exit
PB: predicated region body
PF: predicated region fallthrough
CT: control target
= control target key end

     0   :  { %12 = vsyncpa [#allocation3], 0  ;;  %s859_s0 = inlined_call_operand.hbm [shape: bf16[8,128], index: 0, kind: input, shape index: {}]   ;;  %s860_s1 = inlined_call_operand.hbm [shape: bf16[128,128], index: 1, kind: input, shape index: {}]   ;;  %s861_s2 = inlined_call_operand.vmem [shape: f32[1,128], index: 2, kind: input, shape index: {}]   ;;  %s862_s3 = inlined_call_operand.hbm [shape: bf16[128,128], index: 3, kind: input, shape index: {}]   ;;  %s863_s4 = inlined_call_operand.vmem [shape: f32[1,128], index: 4, kind: input, shape index: {}]   ;;  %s864_s5 = inlined_call_operand.hbm [shape: bf16[128,128], index: 5, kind: input, shape index: {}]   ;;  %s865_s6 = inlined_call_operand.vmem [shape: f32[1,128], index: 6, kind: input, shape index: {}]   ;;  %s866_s7 = inlined_call_operand.hbm [shape: f32[8,128], index: 7, kind: output, shape index: {}]  }
   0x1   :  { %13 = vsyncpa [#allocation6], 0 }
   0x2   :  { %14 = vsyncpa [#allocation9], 0 }
   0x3   :  { %15 = vsyncpa [#allocation4], 0  ;;  %s702_s24 = smov [#allocation5]   ;;  %s584_s28 = scalar_lea.hbm %s860_s1, 1024 }
   0x4   :  { %s31_s25 = sshll.u32 %s702_s24, 4  ;;  %p585_p0 = scmp.ne.s32.totalorder %s860_s1, %s584_s28  ;;  %s32_s25 = int_to_ptr.vmem [resolvable:$true] %s31_s25 }
   0x5   :  { %p588_p1 = scmp.lt.u32.totalorder %s584_s28, %s860_s1 }
   0x7   :  { %p590_p2 = pnand %p588_p1, %p585_p0 }
   0x9   :  { %593 = shalt.err (!%p590_p2)
}
   0xa   :  { %s594_s10 = scalar_lea.vmem %s32_s25, 1024  ;;  %p599_p4 = scmp.lt.s32.totalorder %s32_s25, %s32_s25 }
   0xb   :  { %p595_p3 = scmp.ne.s32.totalorder %s32_s25, %s594_s10  ;;  %p600_p5 = scmp.lt.s32.totalorder %s594_s10, %s594_s10 }
   0xd   :  { %p601_p6 = por %p600_p5, %p599_p4 }
   0xf   :  { %p602_p7 = pnand %p601_p6, %p595_p3 }
  0x11   :  { %605 = shalt.err (!%p602_p7)
}
  0x12   :  { %s703_s11 = smov 64   ;;  %s704_s12 = smov 4  }
  0x13   :  { %37 = dma.hbm_to_vmem [thread:$0]  %s860_s1, 1024, %s32_s25, [#allocation6], %s703_s11, %s703_s11, %s704_s12  }
  0x14   :  { %s705_s15 = smov [#allocation2]   ;;  %s706_s17 = smov [#allocation7]  }
  0x15   :  { %s22_s16 = sshll.u32 %s705_s15, 4  ;;  %s45_s18 = sshll.u32 %s706_s17, 4  ;;  %s23_s16 = int_to_ptr.vmem [resolvable:$true] %s22_s16  ;;  %s46_s18 = int_to_ptr.vmem [resolvable:$true] %s45_s18 }
  0x16   :  { %s606_s21 = scalar_lea.hbm %s859_s0, 64 }
  0x17   :  { %p607_p8 = scmp.ne.s32.totalorder %s859_s0, %s606_s21  ;;  %p610_p9 = scmp.lt.u32.totalorder %s606_s21, %s859_s0 }
  0x19   :  { %p612_p10 = pnand %p610_p9, %p607_p8 }
  0x1b   :  { %615 = shalt.err (!%p612_p10)
}
  0x1c   :  { %s616_s1 = scalar_lea.vmem %s23_s16, 64  ;;  %p621_p12 = scmp.lt.s32.totalorder %s23_s16, %s23_s16 }
  0x1d   :  { %p617_p11 = scmp.ne.s32.totalorder %s23_s16, %s616_s1  ;;  %p622_p13 = scmp.lt.s32.totalorder %s616_s1, %s616_s1 }
  0x1f   :  { %p623_p0 = por %p622_p13, %p621_p12 }
  0x21   :  { %p624_p1 = pnand %p623_p0, %p617_p11 }
  0x23   :  { %627 = shalt.err (!%p624_p1)
}
  0x24   :  { %25 = dma.hbm_to_vmem [thread:$0]  %s859_s0, 64, %s23_s16, [#allocation3]  }
  0x25   :  { %s628_s30 = scalar_lea.hbm %s862_s3, 1024 }
  0x26   :  { %p629_p2 = scmp.ne.s32.totalorder %s862_s3, %s628_s30  ;;  %p632_p3 = scmp.lt.u32.totalorder %s628_s30, %s862_s3 }
  0x28   :  { %p634_p4 = pnand %p632_p3, %p629_p2 }
  0x2a   :  { %637 = shalt.err (!%p634_p4)
}
  0x2b   :  { %s638_s14 = scalar_lea.vmem %s46_s18, 1024  ;;  %p643_p6 = scmp.lt.s32.totalorder %s46_s18, %s46_s18 }
  0x2c   :  { %p639_p5 = scmp.ne.s32.totalorder %s46_s18, %s638_s14  ;;  %p644_p7 = scmp.lt.s32.totalorder %s638_s14, %s638_s14 }
  0x2e   :  { %p645_p8 = por %p644_p7, %p643_p6 }
  0x30   :  { %p646_p9 = pnand %p645_p8, %p639_p5 }
  0x32   :  { %649 = shalt.err (!%p646_p9)
}
  0x33   :  { %51 = dma.hbm_to_vmem [thread:$0]  %s862_s3, 1024, %s46_s18, [#allocation6], %s703_s11, %s703_s11, %s704_s12  }
  0x34   :  { %s707_s16 = smov [#allocation8]   ;;  %s650_s21 = scalar_lea.hbm %s864_s5, 1024 }
  0x35   :  { %s59_s17 = sshll.u32 %s707_s16, 4  ;;  %p651_p10 = scmp.ne.s32.totalorder %s864_s5, %s650_s21  ;;  %s60_s17 = int_to_ptr.vmem [resolvable:$true] %s59_s17 }
  0x36   :  { %p654_p11 = scmp.lt.u32.totalorder %s650_s21, %s864_s5 }
  0x38   :  { %p656_p12 = pnand %p654_p11, %p651_p10 }
  0x3a   :  { %659 = shalt.err (!%p656_p12)
}
  0x3b   :  { %s660_s1 = scalar_lea.vmem %s60_s17, 1024  ;;  %p665_p0 = scmp.lt.s32.totalorder %s60_s17, %s60_s17 }
  0x3c   :  { %p661_p13 = scmp.ne.s32.totalorder %s60_s17, %s660_s1  ;;  %p666_p1 = scmp.lt.s32.totalorder %s660_s1, %s660_s1 }
  0x3e   :  { %p667_p2 = por %p666_p1, %p665_p0 }
  0x40   :  { %p668_p3 = pnand %p667_p2, %p661_p13 }
  0x42   :  { %671 = shalt.err (!%p668_p3)
}
  0x43   :  { %65 = dma.hbm_to_vmem [thread:$0]  %s864_s5, 1024, %s60_s17, [#allocation9], %s703_s11, %s703_s11, %s704_s12  }
  0x44   :  { %694 = dma.done.wait [#allocation3], 64  }
  0x45   :  { %695 = vsyncadd [#allocation3], 4294967232 }
  0x46   :  { %696 = dma.done.wait [#allocation6], 2048  }
  0x47   :  { %697 = vsyncadd [#allocation6], 4294965248 }
  0x48   :  { %698 = dma.done.wait [#allocation9], 1024  }
  0x49   :  { %699 = vsyncadd [#allocation9], 4294966272  ;;  %v708_v0 = vmov 0.0   ;;  %vm709_vm0 = vmmov 0   ;;  %v560_v1 = vld [vmem:[#allocation5] sm:$0xff]   ;;  %v561_v2 = vld [vmem:[#allocation5 + $0x8] sm:$0xff]  }
  0x4a   :  { %491 = vmatprep.subr.bf16.mxu0 %v708_v0  ;;  %507 = vmatprep.mubr.msk.bf16.mxu0 %vm709_vm0, %v708_v0  ;;  %v562_v3 = vld [vmem:[#allocation5 + $0x10] sm:$0xff]   ;;  %v568_v4 = vld [vmem:[#allocation7] sm:$0xff]   ;;  %v563_v5 = vld [vmem:[#allocation5 + $0x18] sm:$0xff]   ;;  %s710_s28 = smov [#allocation10]  }
  0x4b   :  { %511 = vmatprep.subr.bf16.mxu1 %v708_v0  ;;  %527 = vmatprep.mubr.msk.bf16.mxu1 %vm709_vm0, %v708_v0  ;;  %v569_v6 = vld [vmem:[#allocation7 + $0x8] sm:$0xff]   ;;  %v564_v7 = vld [vmem:[#allocation5 + $0x20] sm:$0xff]   ;;  %v570_v8 = vld [vmem:[#allocation7 + $0x10] sm:$0xff]   ;;  %s426_s29 = sshll.u32 %s710_s28, 4  ;;  %s427_s29 = int_to_ptr.vmem [resolvable:$true] %s426_s29 }
  0x4c   :  { %492 = vmatpush3.bf16.msra.mxu0 %v560_v1  ;;  %512 = vmatpush3.bf16.msra.mxu1 %v568_v4  ;;  %v565_v9 = vld [vmem:[#allocation5 + $0x28] sm:$0xff]   ;;  %v571_v10 = vld [vmem:[#allocation7 + $0x18] sm:$0xff]   ;;  %v566_v11 = vld [vmem:[#allocation5 + $0x30] sm:$0xff]   ;;  %p677_p5 = scmp.lt.s32.totalorder %s427_s29, %s427_s29 }
  0x4d   :  { %493 = vmatprep.subr.bf16.mxu0 %v708_v0  ;;  %513 = vmatprep.subr.bf16.mxu1 %v708_v0  ;;  %v572_v12 = vld [vmem:[#allocation7 + $0x20] sm:$0xff]   ;;  %v567_v13 = vld [vmem:[#allocation5 + $0x38] sm:$0xff]   ;;  %v573_v14 = vld [vmem:[#allocation7 + $0x28] sm:$0xff]  }
  0x4e   :  { %v81_v15 = vld [vmem:[#allocation2] sm:$0xf]  ;;  %v574_v16 = vld [vmem:[#allocation7 + $0x30] sm:$0xff]   ;;  %v576_v18 = vld [vmem:[#allocation8] sm:$0xff]  }
  0x4f   :  { %v575_v17 = vld [vmem:[#allocation7 + $0x38] sm:$0xff]   ;;  %v577_v19 = vld [vmem:[#allocation8 + $0x8] sm:$0xff]   ;;  %v578_v20 = vld [vmem:[#allocation8 + $0x10] sm:$0xff]  }
  0x50   :  { %494 = vmatpush3.bf16.msra.mxu0 %v561_v2  ;;  %514 = vmatpush3.bf16.msra.mxu1 %v569_v6  ;;  %v579_v21 = vld [vmem:[#allocation8 + $0x18] sm:$0xff]   ;;  %v580_v22 = vld [vmem:[#allocation8 + $0x20] sm:$0xff]   ;;  %v581_v23 = vld [vmem:[#allocation8 + $0x28] sm:$0xff]  }
  0x51   :  { %495 = vmatprep.subr.bf16.mxu0 %v708_v0  ;;  %515 = vmatprep.subr.bf16.mxu1 %v708_v0  ;;  %v437_v24 = vld [vmem:[%s861_s2] ss:$0 sm:$0xff]  ;;  %v582_v32 = vld [vmem:[#allocation8 + $0x30] sm:$0xff]  }
  0x52   :  { %v583_v33 = vld [vmem:[#allocation8 + $0x38] sm:$0xff]  }
  0x53   :  { %v446_v34 = vld [vmem:[%s863_s4] ss:$0 sm:$0xff]  ;;  %s672_s4 = scalar_lea.vmem %s427_s29, 128 }
  0x54   :  { %496 = vmatpush3.bf16.msra.mxu0 %v562_v3  ;;  %516 = vmatpush3.bf16.msra.mxu1 %v570_v8  ;;  %v455_v42 = vld [vmem:[%s865_s6] ss:$0 sm:$0xff]  ;;  %p673_p4 = scmp.ne.s32.totalorder %s427_s29, %s672_s4  ;;  %p678_p6 = scmp.lt.s32.totalorder %s672_s4, %s672_s4 }
  0x55   :  { %497 = vmatprep.subr.bf16.mxu0 %v708_v0  ;;  %517 = vmatprep.subr.bf16.mxu1 %v708_v0 }
  0x56   :  { %p679_p7 = por %p678_p6, %p677_p5 }
  0x58   :  { %498 = vmatpush3.bf16.msra.mxu0 %v563_v5  ;;  %518 = vmatpush3.bf16.msra.mxu1 %v571_v10  ;;  %p680_p8 = pnand %p679_p7, %p673_p4 }
  0x59   :  { %499 = vmatprep.subr.bf16.mxu0 %v708_v0  ;;  %519 = vmatprep.subr.bf16.mxu1 %v708_v0 }
  0x5c   :  { %500 = vmatpush3.bf16.msra.mxu0 %v564_v7  ;;  %520 = vmatpush3.bf16.msra.mxu1 %v572_v12 }
  0x5d   :  { %501 = vmatprep.subr.bf16.mxu0 %v708_v0  ;;  %521 = vmatprep.subr.bf16.mxu1 %v708_v0 }
  0x60   :  { %502 = vmatpush3.bf16.msra.mxu0 %v565_v9  ;;  %522 = vmatpush3.bf16.msra.mxu1 %v573_v14 }
  0x61   :  { %503 = vmatprep.subr.bf16.mxu0 %v708_v0  ;;  %523 = vmatprep.subr.bf16.mxu1 %v708_v0 }
  0x64   :  { %504 = vmatpush3.bf16.msra.mxu0 %v566_v11  ;;  %524 = vmatpush3.bf16.msra.mxu1 %v574_v16 }
  0x65   :  { %505 = vmatprep.subr.bf16.mxu0 %v708_v0  ;;  %525 = vmatprep.subr.bf16.mxu1 %v708_v0 }
  0x68   :  { %506 = vmatpush3.bf16.msra.mxu0 %v567_v13  ;;  %526 = vmatpush3.bf16.msra.mxu1 %v575_v17 }
  0x69   :  { %531 = vmatprep.subr.bf16.mxu0 %v708_v0 }
  0x6b   :  { %508 = vmatmul.mubr.bf16.vlgmr.msra.gmra.mrb[0].mxu0 %v81_v15 }
  0x6c   :  { %547 = vmatprep.mubr.msk.bf16.mxu0 %vm709_vm0, %v708_v0  ;;  %532 = vmatpush3.bf16.msra.mxu0 %v576_v18 }
  0x6d   :  { %533 = vmatprep.subr.bf16.mxu0 %v708_v0 }
  0x70   :  { %534 = vmatpush3.bf16.msra.mxu0 %v577_v19 }
  0x71   :  { %535 = vmatprep.subr.bf16.mxu0 %v708_v0 }
  0x74   :  { %536 = vmatpush3.bf16.msra.mxu0 %v578_v20 }
  0x75   :  { %537 = vmatprep.subr.bf16.mxu0 %v708_v0 }
  0x78   :  { %538 = vmatpush3.bf16.msra.mxu0 %v579_v21 }
  0x79   :  { %539 = vmatprep.subr.bf16.mxu0 %v708_v0 }
  0x7c   :  { %540 = vmatpush3.bf16.msra.mxu0 %v580_v22 }
  0x7d   :  { %541 = vmatprep.subr.bf16.mxu0 %v708_v0 }
  0x80   :  { %542 = vmatpush3.bf16.msra.mxu0 %v581_v23 }
  0x81   :  { %543 = vmatprep.subr.bf16.mxu0 %v708_v0 }
  0x84   :  { %544 = vmatpush3.bf16.msra.mxu0 %v582_v32 }
  0x85   :  { %545 = vmatprep.subr.bf16.mxu0 %v708_v0 }
  0x88   :  { %546 = vmatpush3.bf16.msra.mxu0 %v583_v33 }
 0x13e   :  { %v187_v25 = vpop.f32.mrb[0].mxu0 }
 0x13f   :  { %v188_v26 = vadd.f32 %v437_v24, %v187_v25  ;;  %v509_v27 = vpop.f32.mrb[1].mxu0 }
 0x140   :  { %v190_v28 = vpop.f32.mrb[2].mxu0 }
 0x141   :  { %v193_v29 = vmax.f32 %v188_v26, 0.0  ;;  %v510_v30 = vpop.f32.mrb[3].mxu0 }
 0x143   :  { %v194_v31 = vpack.c.bf16 %v193_v29, %v193_v29 }
 0x145   :  { %528 = vmatmul.mubr.bf16.vlgmr.msra.gmra.mrb[0].mxu1 %v194_v31 }
 0x218   :  { %v300_v35 = vpop.f32.mrb[0].mxu1 }
 0x219   :  { %v301_v36 = vadd.f32 %v446_v34, %v300_v35  ;;  %v529_v37 = vpop.f32.mrb[1].mxu1 }
 0x21a   :  { %v303_v38 = vpop.f32.mrb[2].mxu1 }
 0x21b   :  { %v306_v39 = vmax.f32 %v301_v36, 0.0  ;;  %v530_v40 = vpop.f32.mrb[3].mxu1 }
 0x21d   :  { %v307_v41 = vpack.c.bf16 %v306_v39, %v306_v39 }
 0x21f   :  { %548 = vmatmul.mubr.bf16.vlgmr.msra.gmra.mrb[4].mxu0 %v307_v41 }
 0x2f2   :  { %v413_v43 = vpop.f32.mrb[4].mxu0 }
 0x2f3   :  { %v414_v44 = vadd.f32 %v455_v42, %v413_v43  ;;  %v549_v45 = vpop.f32.mrb[5].mxu0 }
 0x2f4   :  { %v416_v46 = vpop.f32.mrb[6].mxu0 }
 0x2f5   :  { %419 = vst [vmem:[#allocation10] sm:$0xff] %v414_v44  ;;  %v550_v47 = vpop.f32.mrb[7].mxu0 }
 0x2f6   :  { %683 = shalt.err (!%p680_p8)
}
 0x2f7   :  { %s684_s6 = scalar_lea.hbm %s866_s7, 128 }
 0x2f8   :  { %p685_p9 = scmp.ne.s32.totalorder %s866_s7, %s684_s6  ;;  %p688_p10 = scmp.lt.u32.totalorder %s684_s6, %s866_s7 }
 0x2fa   :  { %p690_p11 = pnand %p688_p10, %p685_p9 }
 0x2fc   :  { %693 = shalt.err (!%p690_p11)
}
 0x2fd   :  { %429 = dma.vmem_to_hbm [thread:$0]  %s427_s29, 128, %s866_s7, [#allocation4]  }
 0x2fe   :  { %700 = dma.done.wait [#allocation4], 128  }
 0x2ff   :  { %701 = vsyncadd [#allocation4], 4294967168 }
 0x300   :  { %433 = vsyncpa [#allocation3], 1 }
 0x301   :  { %434 = vsyncpa [#allocation6], 1 }
 0x302   :  { %435 = vsyncpa [#allocation9], 1 }
 0x303   :  { %436 = vsyncpa [#allocation4], 1 }

</bundles_post_ra>
